<compile_context>
chip_gen: v5e
topology: v5e:2x2
jax: 0.10.0
libtpu: 0.0.40
codegen_flags: <defaults>
</compile_context>

<pallas_src>
import jax
import jax.numpy as jnp
from jax.experimental import pallas as pl
from jax.experimental.pallas import tpu as pltpu

_LANE_CANDIDATES = (512, 256, 128)  # lane-dense slab widths (multiples of 128)
_TARGET_TILE_ROWS = 512             # (512, 512) f32 tile ≈ 1 MiB per operand
_ROW_ALIGN = 8                      # (8, 128) block-shape constraint
_MIN_PALLAS_BYTES = 1 << 20         # below ~1 MiB, launch overhead dwarfs traffic


def _round_up(n: int, m: int) -> int:
    return ((n + m - 1) // m) * m


def _res_add_kernel(x_ref, r_ref, o_ref):
    # Add in the promoted dtype, cast once on store (matches PyTorch
    # add-then-`.to(input.dtype)` semantics).  The cast is a VPU op that is
    # fully hidden under the HBM bottleneck of this streaming kernel.
    o_ref[...] = (x_ref[...] + r_ref[...]).astype(o_ref.dtype)


def res_add(x: jax.Array, residual: jax.Array, *, force_pallas: bool = False) -> jax.Array:
    """Pallas implementation of ResAdd.forward: (x + residual) -> x.dtype."""
    assert x.shape == residual.shape, "ResAdd expects matching shapes"
    out_dtype = x.dtype
    n = x.size

    # Tiny (or empty) tensors: pallas_call fixed launch + DMA setup overhead
    # dwarfs the few KiB of traffic; let XLA fuse the add for free.
    if not force_pallas and (n == 0 or n * jnp.dtype(out_dtype).itemsize < _MIN_PALLAS_BYTES):
        return (x + residual).astype(out_dtype)

    # Pick the widest lane width that exactly divides n so the reshape is a
    # free bitcast (no padding copies).  If n isn't a multiple of 128, the
    # XLA fallback is already optimal for this mem-bound op.
    lanes = next((c for c in _LANE_CANDIDATES if n % c == 0), None)
    if lanes is None or n == 0:
        return (x + residual).astype(out_dtype)

    rows = n // lanes

    # Row tiling: Pallas handles a partial last block, so rows need not be a
    # multiple of the tile.  Aim for >=2 grid steps (megacore sharding on
    # v7x), capped at the ~1 MiB/operand target tile.
    if rows < 2 * _ROW_ALIGN:
        tile_rows = rows  # single block; "equals full dim" satisfies (8,128) rule
    else:
        tile_rows = min(_TARGET_TILE_ROWS, _round_up(pl.cdiv(rows, 2), _ROW_ALIGN))

    x2 = x.reshape(rows, lanes)
    r2 = residual.reshape(rows, lanes)   # residual stays in its ORIGINAL dtype;
                                         # the promote+cast happens in-kernel.
    grid = (pl.cdiv(rows, tile_rows),)

    out = pl.pallas_call(
        _res_add_kernel,
        out_shape=jax.ShapeDtypeStruct((rows, lanes), out_dtype),
        grid_spec=pltpu.PrefetchScalarGridSpec(
            num_scalar_prefetch=0,
            grid=grid,
            in_specs=[
                pl.BlockSpec((tile_rows, lanes), lambda i: (i, 0)),
                pl.BlockSpec((tile_rows, lanes), lambda i: (i, 0)),
            ],
            out_specs=pl.BlockSpec((tile_rows, lanes), lambda i: (i, 0)),
        ),
        compiler_params=pltpu.CompilerParams(
            dimension_semantics=("parallel",),
        ),
        # x2 has the same shape/dtype as the output: write the sum in place
        # (under jit with donation this removes one HBM output allocation;
        # otherwise XLA inserts a copy and semantics are unchanged).
        input_output_aliases={0: 0},
    )(x2, r2)

    return out.reshape(x.shape)


if __name__ == "__main__":
    # ResAdd has no parameters (only identity CastTo ops), so nothing to init.
    key = jax.random.PRNGKey(0)
    k1, k2 = jax.random.split(key)

    # Small NCHW activation shape: batch=2, channels=4, spatial=16x16.
    x = jax.random.normal(k1, (2, 4, 16, 16), dtype=jnp.float32)
    residual = jax.random.normal(k2, (2, 4, 16, 16), dtype=jnp.float32)

    # 1) Force the Pallas path (this tiny shape would otherwise take the
    #    intended XLA fast path).
    out = res_add(x, residual, force_pallas=True)
    jax.block_until_ready(out)
    ref = (x + residual).astype(x.dtype)
    assert out.shape == ref.shape and out.dtype == ref.dtype
    assert jnp.allclose(out, ref, atol=1e-6, rtol=1e-6)

    # 2) Mixed-dtype residual exercises the in-kernel cast (add in promoted
    #    dtype, cast result back to input dtype — matches ResAdd.forward's
    #    align_boundary_dtype behavior).
    r_bf16 = residual.astype(jnp.bfloat16)
    out2 = res_add(x, r_bf16, force_pallas=True)
    jax.block_until_ready(out2)
    ref2 = (x + r_bf16).astype(x.dtype)
    assert out2.dtype == x.dtype
    assert jnp.allclose(out2, ref2, atol=1e-6, rtol=1e-6)

    # 3) A larger, multi-tile shape (rows > tile target would need a big
    #    tensor; this one gives a multi-step grid with a partial last block).
    k3, k4 = jax.random.split(k2)
    xb = jax.random.normal(k3, (2, 8, 40, 128), dtype=jnp.float32)   # n = 81920
    rb = jax.random.normal(k4, (2, 8, 40, 128), dtype=jnp.float32)
    outb = res_add(xb, rb, force_pallas=True)
    jax.block_until_ready(outb)
    refb = (xb + rb).astype(xb.dtype)
    assert jnp.allclose(outb, refb, atol=1e-6, rtol=1e-6)

    # 4) Default path for tiny tensors bypasses Pallas (XLA fuses the add).
    out4 = res_add(x, residual)
    jax.block_until_ready(out4)
    assert jnp.allclose(out4, ref, atol=1e-6, rtol=1e-6)

    print("KERNEL_OK")
</pallas_src>

<mosaic_0001>
module attributes {stable_mosaic.version = 11 : i64} {
  func.func @_res_add_kernel(%arg0: i32, %arg1: memref<4x512xf32, #tpu.memory_space<vmem>>, %arg2: memref<4x512xf32, #tpu.memory_space<vmem>>, %arg3: memref<4x512xf32, #tpu.memory_space<vmem>>) attributes {dimension_semantics = [#tpu.dimension_semantics<parallel>], iteration_bounds = array<i64: 1>, scalar_prefetch = 0 : i64, scratch_operands = 0 : i64, tpu.core_type = #tpu.core_type<tc>, window_params = [{transform_indices = @transform_0, window_bounds = array<i64: 4, 512>}, {transform_indices = @transform_1, window_bounds = array<i64: 4, 512>}, {transform_indices = @transform_2, window_bounds = array<i64: 4, 512>}]} {
    %c0 = arith.constant 0 : index
    %c0_0 = arith.constant 0 : index
    %0 = vector.load %arg1[%c0, %c0_0] : memref<4x512xf32, #tpu.memory_space<vmem>>, vector<4x512xf32>
    %c0_1 = arith.constant 0 : index
    %c0_2 = arith.constant 0 : index
    %1 = vector.load %arg2[%c0_1, %c0_2] : memref<4x512xf32, #tpu.memory_space<vmem>>, vector<4x512xf32>
    %2 = arith.addf %0, %1 : vector<4x512xf32>
    %c0_3 = arith.constant 0 : index
    %c0_4 = arith.constant 0 : index
    %3 = vector.load %arg3[%c0_3, %c0_4] : memref<4x512xf32, #tpu.memory_space<vmem>>, vector<4x512xf32>
    tpu.vector_store %arg3[%c0_3, %c0_4], %2 {strides = array<i32>} : memref<4x512xf32, #tpu.memory_space<vmem>>, vector<4x512xf32>,
    return
  }
  func.func @transform_0(%arg0: i32) -> (i32, i32) {
    %c0_i32 = arith.constant 0 : i32
    %c0_i32_0 = arith.constant 0 : i32
    return %arg0, %c0_i32 : i32, i32
  }
  func.func @transform_1(%arg0: i32) -> (i32, i32) {
    %c0_i32 = arith.constant 0 : i32
    %c0_i32_0 = arith.constant 0 : i32
    return %arg0, %c0_i32 : i32, i32
  }
  func.func @transform_2(%arg0: i32) -> (i32, i32) {
    %c0_i32 = arith.constant 0 : i32
    %c0_i32_0 = arith.constant 0 : i32
    return %arg0, %c0_i32 : i32, i32
  }
}

</mosaic_0001>

<bundles_post_ra>
// kernel: tpu_custom_call.1
= control target key start
LH: loop header
LB: loop body
LE: loop exit
PB: predicated region body
PF: predicated region fallthrough
CT: control target
= control target key end

     0   :  { %7 = vsyncpa [#allocation3], 0  ;;  %s134_s0 = inlined_call_operand.hbm [shape: f32[4,512], index: 0, kind: input, shape index: {}, may-alias: {0,2}]   ;;  %s135_s1 = inlined_call_operand.vmem [shape: f32[4,512], index: 1, kind: input, shape index: {}]   ;;  %s136_s2 = inlined_call_operand.hbm [shape: f32[4,512], index: 2, kind: output, shape index: {}, may-alias: {0,2}]  }
   0x1   :  { %8 = vsyncpa [#allocation4], 0  ;;  %s14_s11 = sshll.u32 %s134_s0, 4  ;;  %s105_s12 = smov [#allocation2]   ;;  %s15_s11 = int_to_ptr.hbm [resolvable:$true] %s14_s11 }
   0x2   :  { %s16_s13 = sshll.u32 %s105_s12, 4  ;;  %s17_s13 = int_to_ptr.vmem [resolvable:$true] %s16_s13 }
   0x3   :  { %19 = dma.hbm_to_vmem [thread:$0]  %s15_s11, 256, %s17_s13, [#allocation3]  }
   0x4   :  { %101 = dma.done.wait [#allocation3], 256  }
   0x5   :  { %102 = vsyncadd [#allocation3], 4294967040  ;;  %s106_s14 = smov [#allocation5]   ;;  %s41_s18 = sshll.u32 %s136_s2, 4  ;;  %v26_v0 = vld [vmem:[#allocation2] sm:$0xff]  ;;  %v27_v2 = vld [vmem:[#allocation2 + $0x8] sm:$0xff]  ;;  %s42_s18 = int_to_ptr.hbm [resolvable:$true] %s41_s18 }
   0x6   :  { %s39_s15 = sshll.u32 %s106_s14, 4  ;;  %v28_v1 = vld [vmem:[%s135_s1] sm:$0xff]  ;;  %v29_v4 = vld [vmem:[%s135_s1 + $0x8] sm:$0xff]  ;;  %s40_s15 = int_to_ptr.vmem [resolvable:$true] %s39_s15 }
   0x7   :  { %v30_v3 = vadd.f32 %v28_v1, %v26_v0  ;;  %v31_v5 = vadd.f32 %v29_v4, %v27_v2 }
   0x9   :  { %32 = vst [vmem:[#allocation5] sm:$0xff] %v30_v3 }
   0xa   :  { %33 = vst [vmem:[#allocation5 + $0x8] sm:$0xff] %v31_v5 }
   0xb   :  { %44 = dma.vmem_to_hbm [thread:$0]  %s40_s15, 256, %s42_s18, [#allocation4]  }
   0xc   :  { %103 = dma.done.wait [#allocation4], 256  }
   0xd   :  { %104 = vsyncadd [#allocation4], 4294967040 }
   0xe   :  { %49 = vsyncpa [#allocation3], 1 }
   0xf   :  { %50 = vsyncpa [#allocation4], 1 }

</bundles_post_ra>
